<compile_context>
chip_gen: v7x
topology: tpu7x:2x2x1
jax: 0.10.0
libtpu: 0.0.40
codegen_flags: <defaults>
</compile_context>

<pallas_src>
import functools

import jax
import jax.numpy as jnp
from jax import lax
from jax.experimental import pallas as pl
from jax.experimental.pallas import tpu as pltpu

HIDDEN = 64      # hidden_dim in the PyTorch script
FEAT = 32        # feature_state[1]
ACTIONS = 4      # action_dim
BATCH = 8
LANE = 2 * HIDDEN  # 128 — every fused operand / output is one full vreg wide


def _dqn_rollout_kernel(x_ref, s0_ref,
                        wf_ref, bf_ref,     # fused front + h pass-through   (128,128)
                        wl_ref, bl_ref,     # fused LSTM, gate cols [i|g|o|f] (128,256)
                        wh1_ref, bh1_ref,   # fused head stage 1             (128,128)
                        wh2_ref, bh2_ref,   # fused head stage 2             (128,128)
                        q_ref, state_ref):
    B, L = state_ref.shape
    H = L // 2
    lane = lax.broadcasted_iota(jnp.int32, (B, L), 1)
    lo = lane < H  # first-half-lane mask

    # --- per-group carry init (state output block is revisited across the T axis) ---
    @pl.when(pl.program_id(1) == 0)
    def _():
        state_ref[...] = s0_ref[...]

    state = state_ref[...]                     # (B,128) f32 = [h | c]

    # --- front Linear + ReLU fused with identity pass-through of h ------------------
    # operand lanes: [ h | x | 0 ]  (x was lane-placed at H..H+FEAT-1 by the wrapper)
    xh = jnp.where(lo, state, x_ref[...])
    pre = jnp.dot(xh.astype(wf_ref.dtype), wf_ref[...],
                  preferred_element_type=jnp.float32) + bf_ref[...]
    fh = jnp.where(lo, jnp.maximum(pre, 0.0), pre)     # [ relu(x@Wf^T+bf) | h ]

    # --- LSTMCell: single fused matmul, gate cols [i|g|o|f], g pre-scaled by 2 -------
    gates = jnp.dot(fh.astype(wl_ref.dtype), wl_ref[...],
                    preferred_element_type=jnp.float32) + bl_ref[...]
    p_ig = gates[:, :L]                        # [ i | 2*g ]   (full-vreg aligned slice)
    q_of = gates[:, L:]                        # [ o | f   ]
    s = jax.nn.sigmoid(p_ig)                   # one EUP pass covers i and g halves
    m = jnp.where(lo, s, 2.0 * s - 1.0)        # [ sig(i) | tanh(g) ]  (tanh = 2*sig(2x)-1)
    s_of = jax.nn.sigmoid(q_of)                # [ sig(o) | sig(f) ]
    ig = m * pltpu.roll(m, H, axis=1)          # sig(i)*tanh(g) in both halves
    t = s_of * state + ig                      # lanes H:: sig(f)*c + sig(i)*tanh(g) = c_new
    tc = jnp.tanh(t)
    hh = s_of * pltpu.roll(tc, H, axis=1)      # lanes :H: sig(o)*tanh(c_new) = h_new
    new_state = jnp.where(lo, hh, t)           # [ h_new | c_new ]
    state_ref[...] = new_state

    # --- duelling heads (fused, lane-dense) ------------------------------------------
    hs = jnp.maximum(
        jnp.dot(new_state.astype(wh1_ref.dtype), wh1_ref[...],
                preferred_element_type=jnp.float32) + bh1_ref[...], 0.0)   # [vs | advs]
    head = jnp.dot(hs.astype(wh2_ref.dtype), wh2_ref[...],
                   preferred_element_type=jnp.float32) + bh2_ref[...]
    # head lanes H..H+A-1 = value + advantage; lane L-1 = (1/A)*sum_a advantage (per row,
    # weight-folded).  Summing that lane over the batch gives (1/A)*advantage.sum() exactly
    # as in the PyTorch forward (the all-element .sum()); no other lane needs to be zero.
    adv_total = jnp.sum(jnp.where(lane == L - 1, head, 0.0))
    q_ref[...] = head - adv_total              # lanes H..H+A-1 hold q


@functools.partial(jax.jit, static_argnames=("action_dim",))
def duelling_lstm_dqn_rollout(x, hidden, fused, *, action_dim):
    """x: (G,T,B,FEAT) f32; hidden: (h0,c0) each (G,B,HIDDEN); fused: fuse_params(...).

    Returns q: (G,T,B,action_dim) and final (h,c).  Each group g is one independent
    forward-call batch (the duelling sum is taken per group, as in the PyTorch call).
    """
    h0, c0 = hidden
    G, T, B, F = x.shape
    H = h0.shape[-1]
    L = 2 * H
    assert F <= H and action_dim < H, "feature/action dims must fit the 128-lane fusion"

    # Once per rollout (not per step): lane-place x at lanes [H, H+F) and pack [h|c].
    x_slab = jnp.pad(x, ((0, 0), (0, 0), (0, 0), (H, L - H - F)))   # (G,T,B,L)
    state0 = jnp.concatenate([h0, c0], axis=-1)                      # (G,B,L)

    def wspec(shape):
        return pl.BlockSpec(shape, lambda g, t, _n=len(shape): (0,) * _n)

    q_slab, state_out = pl.pallas_call(
        _dqn_rollout_kernel,
        grid=(G, T),
        in_specs=[
            pl.BlockSpec((None, None, B, L), lambda g, t: (g, t, 0, 0)),  # x_t (streamed)
            pl.BlockSpec((None, B, L), lambda g, t: (g, 0, 0)),           # initial [h|c]
            wspec((L, L)), wspec((1, L)),            # front   (weights resident in VMEM)
            wspec((L, 2 * L)), wspec((1, 2 * L)),    # lstm
            wspec((L, L)), wspec((1, L)),            # head1
            wspec((L, L)), wspec((1, L)),            # head2
        ],
        out_specs=(
            pl.BlockSpec((None, None, B, L), lambda g, t: (g, t, 0, 0)),  # q slab per step
            pl.BlockSpec((None, B, L), lambda g, t: (g, 0, 0)),           # carried [h|c]
        ),
        out_shape=(jax.ShapeDtypeStruct((G, T, B, L), jnp.float32),
                   jax.ShapeDtypeStruct((G, B, L), jnp.float32)),
        compiler_params=pltpu.CompilerParams(
            dimension_semantics=("parallel", "arbitrary")),
    )(x_slab, state0,
      fused["w_front"], fused["b_front"],
      fused["w_lstm"], fused["b_lstm"],
      fused["w_head1"], fused["b_head1"],
      fused["w_head2"], fused["b_head2"])

    q = q_slab[..., H:H + action_dim]
    hT = state_out[..., :H]
    cT = state_out[..., H:]
    return q, (hT, cT)


def _init_linear(key, out_dim, in_dim):
    # PyTorch default init: U(-1/sqrt(fan_in), 1/sqrt(fan_in))
    k1, k2 = jax.random.split(key)
    bound = 1.0 / jnp.sqrt(in_dim)
    w = jax.random.uniform(k1, (out_dim, in_dim), jnp.float32, -bound, bound)
    b = jax.random.uniform(k2, (1, out_dim), jnp.float32, -bound, bound)
    return w, b


def make_params(key, feat, hidden, action_dim):
    """Raw parameters in PyTorch (out_features, in_features) convention."""
    keys = jax.random.split(key, 8)
    wf, bf = _init_linear(keys[0], hidden, feat)
    wih, bih = _init_linear(keys[1], 4 * hidden, hidden)   # LSTMCell weight_ih/bias_ih
    whh, bhh = _init_linear(keys[2], 4 * hidden, hidden)   # LSTMCell weight_hh/bias_hh
    wv1, bv1 = _init_linear(keys[3], hidden, hidden)
    wa1, ba1 = _init_linear(keys[4], hidden, hidden)
    wv, bv = _init_linear(keys[5], 1, hidden)
    wa, ba = _init_linear(keys[6], action_dim, hidden)
    return dict(wf=wf, bf=bf, wih=wih, whh=whh, bih=bih, bhh=bhh,
                wv1=wv1, bv1=bv1, wv=wv, bv=bv, wa1=wa1, ba1=ba1, wa=wa, ba=ba)


def fuse_params(p, *, feat, hidden, action_dim, weight_dtype=jnp.bfloat16):
    """Pre-transpose / block-fuse / lane-pad all weights once, outside the kernel.

    Weight matrices are stored in `weight_dtype` (bf16 by default: MXU-native on
    v5e/v6e/v7x with f32 accumulation); biases stay f32.
    """
    H, L, A = hidden, 2 * hidden, action_dim
    f32 = jnp.float32
    assert feat <= H and A < H

    # front + identity h pass-through: operand [h | x | 0] -> [x@Wf^T + bf (pre-relu) | h]
    w_front = jnp.zeros((L, L), f32)
    w_front = w_front.at[H:H + feat, :H].set(p["wf"].T)
    w_front = w_front.at[:H, H:].set(jnp.eye(H, dtype=f32))
    b_front = jnp.zeros((1, L), f32).at[:, :H].set(p["bf"])

    # fused LSTM weight (K=128, N=256); PyTorch gate columns [i|f|g|o] -> [i|g|o|f];
    # g columns pre-scaled by 2 so the kernel uses tanh(x) = 2*sigmoid(2x) - 1.
    w_std = jnp.concatenate([p["wih"].T, p["whh"].T], axis=0)   # (L, 4H)
    b_std = p["bih"] + p["bhh"]                                 # (1, 4H)
    perm = jnp.concatenate([jnp.arange(0, H), jnp.arange(2 * H, 3 * H),
                            jnp.arange(3 * H, 4 * H), jnp.arange(H, 2 * H)])
    w_lstm = w_std[:, perm].at[:, H:2 * H].multiply(2.0)
    b_lstm = b_std[:, perm].at[:, H:2 * H].multiply(2.0)

    # head stage 1: [h_new | c_new] @ w_head1 -> [vs_pre | advs_pre]  (c rows zeroed)
    w_head1 = jnp.zeros((L, L), f32)
    w_head1 = w_head1.at[:H, :H].set(p["wv1"].T)
    w_head1 = w_head1.at[:H, H:].set(p["wa1"].T)
    b_head1 = jnp.concatenate([p["bv1"], p["ba1"]], axis=-1)

    # head stage 2: [vs | advs] ->
    #   lanes H..H+A-1 = value + advantage;  lane L-1 = (1/A)*sum_a advantage (folded mean).
    w_head2 = jnp.zeros((L, L), f32)
    w_head2 = w_head2.at[H:, H:H + A].set(p["wa"].T)
    w_head2 = w_head2.at[:H, H:H + A].set(jnp.tile(p["wv"].T, (1, A)))
    w_head2 = w_head2.at[H:, L - 1].set(p["wa"].T.sum(axis=1) / A)
    b_head2 = jnp.zeros((1, L), f32)
    b_head2 = b_head2.at[:, H:H + A].set(p["ba"] + p["bv"])
    b_head2 = b_head2.at[:, L - 1].set(jnp.sum(p["ba"]) / A)

    wd = weight_dtype
    return dict(w_front=w_front.astype(wd), b_front=b_front,
                w_lstm=w_lstm.astype(wd), b_lstm=b_lstm,
                w_head1=w_head1.astype(wd), b_head1=b_head1,
                w_head2=w_head2.astype(wd), b_head2=b_head2)


def reference_rollout(x, hidden, params, action_dim):
    """Pure-JAX reference mirroring the PyTorch forward per timestep (unfused params)."""
    h, c = hidden                               # (G,B,H)
    G, T, B, F = x.shape
    H = h.shape[-1]
    qs = []
    for t in range(T):
        f = jnp.maximum(x[:, t] @ params["wf"].T + params["bf"], 0.0)
        gates = (f @ params["wih"].T + params["bih"]
                 + h @ params["whh"].T + params["bhh"])
        i_g = jax.nn.sigmoid(gates[..., 0 * H:1 * H])
        f_g = jax.nn.sigmoid(gates[..., 1 * H:2 * H])
        g_g = jnp.tanh(gates[..., 2 * H:3 * H])
        o_g = jax.nn.sigmoid(gates[..., 3 * H:4 * H])
        c = f_g * c + i_g * g_g
        h = o_g * jnp.tanh(c)
        vs = jnp.maximum(h @ params["wv1"].T + params["bv1"], 0.0)
        value = vs @ params["wv"].T + params["bv"]
        advs = jnp.maximum(h @ params["wa1"].T + params["ba1"], 0.0)
        adv = advs @ params["wa"].T + params["ba"]
        # PyTorch .sum(): over ALL elements of this forward call's batch (per group here).
        q = value + adv - (1.0 / action_dim) * jnp.sum(adv, axis=(-2, -1), keepdims=True)
        qs.append(q)
    return jnp.stack(qs, axis=1), (h, c)


if __name__ == "__main__":
    key = jax.random.PRNGKey(0)
    k_param, k_x, k_h, k_c = jax.random.split(key, 4)

    GROUPS, STEPS = 2, 8   # 2 independent env groups (v7x megacore), 8-step rollout
    params = make_params(k_param, FEAT, HIDDEN, ACTIONS)
    fused = fuse_params(params, feat=FEAT, hidden=HIDDEN, action_dim=ACTIONS)

    x = jax.random.normal(k_x, (GROUPS, STEPS, BATCH, FEAT), jnp.float32)
    h0 = jax.random.normal(k_h, (GROUPS, BATCH, HIDDEN), jnp.float32)
    c0 = jax.random.normal(k_c, (GROUPS, BATCH, HIDDEN), jnp.float32)

    q, (hT, cT) = duelling_lstm_dqn_rollout(x, (h0, c0), fused, action_dim=ACTIONS)
    jax.block_until_ready((q, hT, cT))

    # Validate against a pure-JAX reference that uses the same bf16-rounded weight
    # matrices the kernel consumes (isolates kernel correctness from the intended bf16
    # weight quantization; end-task metrics are the right check for the quantization
    # itself).  Biases stay f32 in both.
    q_keys = ("wf", "wih", "whh", "wv1", "wa1", "wv", "wa")
    params_q = {k: (v.astype(jnp.bfloat16).astype(jnp.float32) if k in q_keys else v)
                for k, v in params.items()}
    q_ref, (hT_ref, cT_ref) = reference_rollout(x, (h0, c0), params_q, ACTIONS)

    for got, ref, name in ((q, q_ref, "q"), (hT, hT_ref, "h"), (cT, cT_ref, "c")):
        err = float(jnp.max(jnp.abs(got - ref)))
        assert jnp.allclose(got, ref, atol=1e-2, rtol=1e-2), (name, err)

    print("KERNEL_OK")
</pallas_src>

<mosaic_0001>
module attributes {stable_mosaic.version = 11 : i64} {
  func.func @_dqn_rollout_kernel(%arg0: i32, %arg1: i32, %arg2: memref<1x1x8x128xf32, #tpu.memory_space<vmem>>, %arg3: memref<1x8x128xf32, #tpu.memory_space<vmem>>, %arg4: memref<128x128xbf16, #tpu.memory_space<vmem>>, %arg5: memref<1x128xf32, #tpu.memory_space<vmem>>, %arg6: memref<128x256xbf16, #tpu.memory_space<vmem>>, %arg7: memref<1x256xf32, #tpu.memory_space<vmem>>, %arg8: memref<128x128xbf16, #tpu.memory_space<vmem>>, %arg9: memref<1x128xf32, #tpu.memory_space<vmem>>, %arg10: memref<128x128xbf16, #tpu.memory_space<vmem>>, %arg11: memref<1x128xf32, #tpu.memory_space<vmem>>, %arg12: memref<1x1x8x128xf32, #tpu.memory_space<vmem>>, %arg13: memref<1x8x128xf32, #tpu.memory_space<vmem>>) attributes {dimension_semantics = [#tpu.dimension_semantics<parallel>, #tpu.dimension_semantics<arbitrary>], iteration_bounds = array<i64: 2, 8>, scalar_prefetch = 0 : i64, scratch_operands = 0 : i64, tpu.core_type = #tpu.core_type<tc>, window_params = [{transform_indices = @transform_0, window_bounds = array<i64: 1, 1, 8, 128>}, {transform_indices = @transform_1, window_bounds = array<i64: 1, 8, 128>}, {pipeline_mode = #tpu.pipeline_mode<synchronous>, transform_indices = @transform_2, window_bounds = array<i64: 128, 128>}, {pipeline_mode = #tpu.pipeline_mode<synchronous>, transform_indices = @transform_3, window_bounds = array<i64: 1, 128>}, {pipeline_mode = #tpu.pipeline_mode<synchronous>, transform_indices = @transform_4, window_bounds = array<i64: 128, 256>}, {pipeline_mode = #tpu.pipeline_mode<synchronous>, transform_indices = @transform_5, window_bounds = array<i64: 1, 256>}, {pipeline_mode = #tpu.pipeline_mode<synchronous>, transform_indices = @transform_6, window_bounds = array<i64: 128, 128>}, {pipeline_mode = #tpu.pipeline_mode<synchronous>, transform_indices = @transform_7, window_bounds = array<i64: 1, 128>}, {pipeline_mode = #tpu.pipeline_mode<synchronous>, transform_indices = @transform_8, window_bounds = array<i64: 128, 128>}, {pipeline_mode = #tpu.pipeline_mode<synchronous>, transform_indices = @transform_9, window_bounds = array<i64: 1, 128>}, {transform_indices = @transform_10, window_bounds = array<i64: 1, 1, 8, 128>}, {transform_indices = @transform_11, window_bounds = array<i64: 1, 8, 128>}]} {
    %0 = tpu.iota {dimensions = array<i32: 1>} : vector<8x128xi32>
    %c64_i32 = arith.constant 64 : i32
    %1 = vector.broadcast %c64_i32 : i32 to vector<8x128xi32>
    %2 = arith.cmpi slt, %0, %1 : vector<8x128xi32>
    %c0_i32 = arith.constant 0 : i32
    %3 = arith.cmpi eq, %arg1, %c0_i32 : i32
    %4 = arith.extui %3 : i1 to i32
    %c0_i32_0 = arith.constant 0 : i32
    %5 = arith.cmpi ne, %4, %c0_i32_0 : i32
    scf.if %5 {
      %c0_43 = arith.constant 0 : index
      %c0_44 = arith.constant 0 : index
      %c0_45 = arith.constant 0 : index
      %81 = vector.load %arg3[%c0_43, %c0_44, %c0_45] : memref<1x8x128xf32, #tpu.memory_space<vmem>>, vector<1x8x128xf32>
      %82 = vector.shape_cast %81 : vector<1x8x128xf32> to vector<8x128xf32>
      %c0_46 = arith.constant 0 : index
      %c0_47 = arith.constant 0 : index
      %c0_48 = arith.constant 0 : index
      %83 = vector.load %arg13[%c0_46, %c0_47, %c0_48] : memref<1x8x128xf32, #tpu.memory_space<vmem>>, vector<1x8x128xf32>
      %84 = vector.shape_cast %83 : vector<1x8x128xf32> to vector<8x128xf32>
      %85 = vector.shape_cast %82 : vector<8x128xf32> to vector<1x8x128xf32>
      tpu.vector_store %arg13[%c0_46, %c0_47, %c0_48], %85 {strides = array<i32>} : memref<1x8x128xf32, #tpu.memory_space<vmem>>, vector<1x8x128xf32>,
    } else {
    }
    %c0 = arith.constant 0 : index
    %c0_1 = arith.constant 0 : index
    %c0_2 = arith.constant 0 : index
    %6 = vector.load %arg13[%c0, %c0_1, %c0_2] : memref<1x8x128xf32, #tpu.memory_space<vmem>>, vector<1x8x128xf32>
    %7 = vector.shape_cast %6 : vector<1x8x128xf32> to vector<8x128xf32>
    %c0_3 = arith.constant 0 : index
    %c0_4 = arith.constant 0 : index
    %c0_5 = arith.constant 0 : index
    %c0_6 = arith.constant 0 : index
    %8 = vector.load %arg2[%c0_3, %c0_4, %c0_5, %c0_6] : memref<1x1x8x128xf32, #tpu.memory_space<vmem>>, vector<1x1x8x128xf32>
    %9 = vector.shape_cast %8 : vector<1x1x8x128xf32> to vector<8x128xf32>
    %10 = arith.select %2, %7, %9 : vector<8x128xi1>, vector<8x128xf32>
    %11 = arith.truncf %10 : vector<8x128xf32> to vector<8x128xbf16>
    %c0_7 = arith.constant 0 : index
    %c0_8 = arith.constant 0 : index
    %12 = vector.load %arg4[%c0_7, %c0_8] : memref<128x128xbf16, #tpu.memory_space<vmem>>, vector<128x128xbf16>
    %cst = arith.constant dense<0.000000e+00> : vector<8x128xf32>
    %13 = tpu.matmul %11, %12, %cst {dimension_numbers = #tpu.dot_dimension_numbers<[1], [0], [0], [1], [0, 0, 1, 1], [], []>} : vector<8x128xbf16>, vector<128x128xbf16>, vector<8x128xf32> -> vector<8x128xf32>
    %c0_9 = arith.constant 0 : index
    %c0_10 = arith.constant 0 : index
    %14 = vector.load %arg5[%c0_9, %c0_10] : memref<1x128xf32, #tpu.memory_space<vmem>>, vector<1x128xf32>
    %15 = vector.broadcast %14 : vector<1x128xf32> to vector<8x128xf32>
    %16 = arith.addf %13, %15 : vector<8x128xf32>
    %cst_11 = arith.constant 0.000000e+00 : f32
    %17 = vector.broadcast %cst_11 : f32 to vector<8x128xf32>
    %18 = arith.maximumf %16, %17 : vector<8x128xf32>
    %19 = arith.select %2, %18, %16 : vector<8x128xi1>, vector<8x128xf32>
    %20 = arith.truncf %19 : vector<8x128xf32> to vector<8x128xbf16>
    %c0_12 = arith.constant 0 : index
    %c0_13 = arith.constant 0 : index
    %21 = vector.load %arg6[%c0_12, %c0_13] : memref<128x256xbf16, #tpu.memory_space<vmem>>, vector<128x256xbf16>
    %cst_14 = arith.constant dense<0.000000e+00> : vector<8x256xf32>
    %22 = tpu.matmul %20, %21, %cst_14 {dimension_numbers = #tpu.dot_dimension_numbers<[1], [0], [0], [1], [0, 0, 1, 1], [], []>} : vector<8x128xbf16>, vector<128x256xbf16>, vector<8x256xf32> -> vector<8x256xf32>
    %c0_15 = arith.constant 0 : index
    %c0_16 = arith.constant 0 : index
    %23 = vector.load %arg7[%c0_15, %c0_16] : memref<1x256xf32, #tpu.memory_space<vmem>>, vector<1x256xf32>
    %24 = vector.broadcast %23 : vector<1x256xf32> to vector<8x256xf32>
    %25 = arith.addf %22, %24 : vector<8x256xf32>
    %26 = vector.extract_strided_slice %25 {offsets = [0, 0], sizes = [8, 128], strides = [1, 1]} : vector<8x256xf32> to vector<8x128xf32>
    %27 = vector.extract_strided_slice %25 {offsets = [0, 128], sizes = [8, 128], strides = [1, 1]} : vector<8x256xf32> to vector<8x128xf32>
    %28 = arith.negf %26 : vector<8x128xf32>
    %29 = math.exp %28 : vector<8x128xf32>
    %cst_17 = arith.constant 1.000000e+00 : f32
    %30 = vector.broadcast %cst_17 : f32 to vector<8x128xf32>
    %31 = arith.addf %30, %29 : vector<8x128xf32>
    %32 = arith.divf %30, %31 : vector<8x128xf32>
    %cst_18 = arith.constant 2.000000e+00 : f32
    %33 = vector.broadcast %cst_18 : f32 to vector<8x128xf32>
    %34 = arith.mulf %33, %32 : vector<8x128xf32>
    %cst_19 = arith.constant 1.000000e+00 : f32
    %35 = vector.broadcast %cst_19 : f32 to vector<8x128xf32>
    %36 = arith.subf %34, %35 : vector<8x128xf32>
    %37 = arith.select %2, %32, %36 : vector<8x128xi1>, vector<8x128xf32>
    %38 = arith.negf %27 : vector<8x128xf32>
    %39 = math.exp %38 : vector<8x128xf32>
    %cst_20 = arith.constant 1.000000e+00 : f32
    %40 = vector.broadcast %cst_20 : f32 to vector<8x128xf32>
    %41 = arith.addf %40, %39 : vector<8x128xf32>
    %42 = arith.divf %40, %41 : vector<8x128xf32>
    %c64_i32_21 = arith.constant 64 : i32
    %43 = tpu.dynamic_rotate %37 by %c64_i32_21 dim 1 : vector<8x128xf32>, i32 -> vector<8x128xf32>
    %44 = arith.mulf %37, %43 : vector<8x128xf32>
    %45 = arith.mulf %42, %7 : vector<8x128xf32>
    %46 = arith.addf %45, %44 : vector<8x128xf32>
    %47 = math.tanh %46 : vector<8x128xf32>
    %c64_i32_22 = arith.constant 64 : i32
    %48 = tpu.dynamic_rotate %47 by %c64_i32_22 dim 1 : vector<8x128xf32>, i32 -> vector<8x128xf32>
    %49 = arith.mulf %42, %48 : vector<8x128xf32>
    %50 = arith.select %2, %49, %46 : vector<8x128xi1>, vector<8x128xf32>
    %c0_23 = arith.constant 0 : index
    %c0_24 = arith.constant 0 : index
    %c0_25 = arith.constant 0 : index
    %51 = vector.load %arg13[%c0_23, %c0_24, %c0_25] : memref<1x8x128xf32, #tpu.memory_space<vmem>>, vector<1x8x128xf32>
    %52 = vector.shape_cast %51 : vector<1x8x128xf32> to vector<8x128xf32>
    %53 = vector.shape_cast %50 : vector<8x128xf32> to vector<1x8x128xf32>
    tpu.vector_store %arg13[%c0_23, %c0_24, %c0_25], %53 {strides = array<i32>} : memref<1x8x128xf32, #tpu.memory_space<vmem>>, vector<1x8x128xf32>,
    %54 = arith.truncf %50 : vector<8x128xf32> to vector<8x128xbf16>
    %c0_26 = arith.constant 0 : index
    %c0_27 = arith.constant 0 : index
    %55 = vector.load %arg8[%c0_26, %c0_27] : memref<128x128xbf16, #tpu.memory_space<vmem>>, vector<128x128xbf16>
    %cst_28 = arith.constant dense<0.000000e+00> : vector<8x128xf32>
    %56 = tpu.matmul %54, %55, %cst_28 {dimension_numbers = #tpu.dot_dimension_numbers<[1], [0], [0], [1], [0, 0, 1, 1], [], []>} : vector<8x128xbf16>, vector<128x128xbf16>, vector<8x128xf32> -> vector<8x128xf32>
    %c0_29 = arith.constant 0 : index
    %c0_30 = arith.constant 0 : index
    %57 = vector.load %arg9[%c0_29, %c0_30] : memref<1x128xf32, #tpu.memory_space<vmem>>, vector<1x128xf32>
    %58 = vector.broadcast %57 : vector<1x128xf32> to vector<8x128xf32>
    %59 = arith.addf %56, %58 : vector<8x128xf32>
    %cst_31 = arith.constant 0.000000e+00 : f32
    %60 = vector.broadcast %cst_31 : f32 to vector<8x128xf32>
    %61 = arith.maximumf %59, %60 : vector<8x128xf32>
    %62 = arith.truncf %61 : vector<8x128xf32> to vector<8x128xbf16>
    %c0_32 = arith.constant 0 : index
    %c0_33 = arith.constant 0 : index
    %63 = vector.load %arg10[%c0_32, %c0_33] : memref<128x128xbf16, #tpu.memory_space<vmem>>, vector<128x128xbf16>
    %cst_34 = arith.constant dense<0.000000e+00> : vector<8x128xf32>
    %64 = tpu.matmul %62, %63, %cst_34 {dimension_numbers = #tpu.dot_dimension_numbers<[1], [0], [0], [1], [0, 0, 1, 1], [], []>} : vector<8x128xbf16>, vector<128x128xbf16>, vector<8x128xf32> -> vector<8x128xf32>
    %c0_35 = arith.constant 0 : index
    %c0_36 = arith.constant 0 : index
    %65 = vector.load %arg11[%c0_35, %c0_36] : memref<1x128xf32, #tpu.memory_space<vmem>>, vector<1x128xf32>
    %66 = vector.broadcast %65 : vector<1x128xf32> to vector<8x128xf32>
    %67 = arith.addf %64, %66 : vector<8x128xf32>
    %c127_i32 = arith.constant 127 : i32
    %68 = vector.broadcast %c127_i32 : i32 to vector<8x128xi32>
    %69 = arith.cmpi eq, %0, %68 : vector<8x128xi32>
    %cst_37 = arith.constant 0.000000e+00 : f32
    %70 = vector.broadcast %cst_37 : f32 to vector<8x128xf32>
    %71 = arith.select %69, %67, %70 : vector<8x128xi1>, vector<8x128xf32>
    %72 = vector.shape_cast %71 : vector<8x128xf32> to vector<1x8x128xf32>
    %cst_38 = arith.constant dense<0.000000e+00> : vector<1xf32>
    %73 = vector.multi_reduction <add>, %72, %cst_38 [1, 2] : vector<1x8x128xf32> to vector<1xf32>
    %74 = vector.shape_cast %73 : vector<1xf32> to vector<1x1x1xf32>
    %75 = vector.extract %74[0, 0, 0] : f32 from vector<1x1x1xf32>
    %76 = vector.broadcast %75 : f32 to vector<8x128xf32>
    %77 = arith.subf %67, %76 : vector<8x128xf32>
    %c0_39 = arith.constant 0 : index
    %c0_40 = arith.constant 0 : index
    %c0_41 = arith.constant 0 : index
    %c0_42 = arith.constant 0 : index
    %78 = vector.load %arg12[%c0_39, %c0_40, %c0_41, %c0_42] : memref<1x1x8x128xf32, #tpu.memory_space<vmem>>, vector<1x1x8x128xf32>
    %79 = vector.shape_cast %78 : vector<1x1x8x128xf32> to vector<8x128xf32>
    %80 = vector.shape_cast %77 : vector<8x128xf32> to vector<1x1x8x128xf32>
    tpu.vector_store %arg12[%c0_39, %c0_40, %c0_41, %c0_42], %80 {strides = array<i32>} : memref<1x1x8x128xf32, #tpu.memory_space<vmem>>, vector<1x1x8x128xf32>,
    return
  }
  func.func @transform_0(%arg0: i32, %arg1: i32) -> (i32, i32, i32, i32) {
    %c0_i32 = arith.constant 0 : i32
    %c0_i32_0 = arith.constant 0 : i32
    %c0_i32_1 = arith.constant 0 : i32
    return %arg0, %arg1, %c0_i32, %c0_i32_0 : i32, i32, i32, i32
  }
  func.func @transform_1(%arg0: i32, %arg1: i32) -> (i32, i32, i32) {
    %c0_i32 = arith.constant 0 : i32
    %c0_i32_0 = arith.constant 0 : i32
    %c0_i32_1 = arith.constant 0 : i32
    return %arg0, %c0_i32, %c0_i32_0 : i32, i32, i32
  }
  func.func @transform_2(%arg0: i32, %arg1: i32) -> (i32, i32) {
    %c0_i32 = arith.constant 0 : i32
    %c0_i32_0 = arith.constant 0 : i32
    %c0_i32_1 = arith.constant 0 : i32
    return %c0_i32, %c0_i32_0 : i32, i32
  }
  func.func @transform_3(%arg0: i32, %arg1: i32) -> (i32, i32) {
    %c0_i32 = arith.constant 0 : i32
    %c0_i32_0 = arith.constant 0 : i32
    %c0_i32_1 = arith.constant 0 : i32
    return %c0_i32, %c0_i32_0 : i32, i32
  }
  func.func @transform_4(%arg0: i32, %arg1: i32) -> (i32, i32) {
    %c0_i32 = arith.constant 0 : i32
    %c0_i32_0 = arith.constant 0 : i32
    %c0_i32_1 = arith.constant 0 : i32
    return %c0_i32, %c0_i32_0 : i32, i32
  }
  func.func @transform_5(%arg0: i32, %arg1: i32) -> (i32, i32) {
    %c0_i32 = arith.constant 0 : i32
    %c0_i32_0 = arith.constant 0 : i32
    %c0_i32_1 = arith.constant 0 : i32
    return %c0_i32, %c0_i32_0 : i32, i32
  }
  func.func @transform_6(%arg0: i32, %arg1: i32) -> (i32, i32) {
    %c0_i32 = arith.constant 0 : i32
    %c0_i32_0 = arith.constant 0 : i32
    %c0_i32_1 = arith.constant 0 : i32
    return %c0_i32, %c0_i32_0 : i32, i32
  }
  func.func @transform_7(%arg0: i32, %arg1: i32) -> (i32, i32) {
    %c0_i32 = arith.constant 0 : i32
    %c0_i32_0 = arith.constant 0 : i32
    %c0_i32_1 = arith.constant 0 : i32
    return %c0_i32, %c0_i32_0 : i32, i32
  }
  func.func @transform_8(%arg0: i32, %arg1: i32) -> (i32, i32) {
    %c0_i32 = arith.constant 0 : i32
    %c0_i32_0 = arith.constant 0 : i32
    %c0_i32_1 = arith.constant 0 : i32
    return %c0_i32, %c0_i32_0 : i32, i32
  }
  func.func @transform_9(%arg0: i32, %arg1: i32) -> (i32, i32) {
    %c0_i32 = arith.constant 0 : i32
    %c0_i32_0 = arith.constant 0 : i32
    %c0_i32_1 = arith.constant 0 : i32
    return %c0_i32, %c0_i32_0 : i32, i32
  }
  func.func @transform_10(%arg0: i32, %arg1: i32) -> (i32, i32, i32, i32) {
    %c0_i32 = arith.constant 0 : i32
    %c0_i32_0 = arith.constant 0 : i32
    %c0_i32_1 = arith.constant 0 : i32
    return %arg0, %arg1, %c0_i32, %c0_i32_0 : i32, i32, i32, i32
  }
  func.func @transform_11(%arg0: i32, %arg1: i32) -> (i32, i32, i32) {
    %c0_i32 = arith.constant 0 : i32
    %c0_i32_0 = arith.constant 0 : i32
    %c0_i32_1 = arith.constant 0 : i32
    return %arg0, %c0_i32, %c0_i32_0 : i32, i32, i32
  }
}

</mosaic_0001>

<bundles_post_ra>
// kernel: duelling_lstm_dqn_rollout.1
= control target key start
LH: loop header
LB: loop body
LE: loop exit
PB: predicated region body
PF: predicated region fallthrough
CT: control target
= control target key end

     0   :  { %17 = vsyncpa [#allocation3], 0  ;;  %s1942_s0 = inlined_call_operand.vmem [shape: f32[2,8,8,128], index: 0, kind: input, shape index: {}]   ;;  %s1943_s1 = inlined_call_operand.vmem [shape: f32[2,8,128], index: 1, kind: input, shape index: {}]   ;;  %s1944_s2 = inlined_call_operand.vmem [shape: bf16[128,128], index: 2, kind: input, shape index: {}]   ;;  %s1945_s3 = inlined_call_operand.hbm [shape: f32[1,128], index: 3, kind: input, shape index: {}]   ;;  %s1946_s4 = inlined_call_operand.vmem [shape: bf16[128,256], index: 4, kind: input, shape index: {}]   ;;  %s1947_s5 = inlined_call_operand.vmem [shape: f32[1,256], index: 5, kind: input, shape index: {}]   ;;  %s1948_s6 = inlined_call_operand.vmem [shape: bf16[128,128], index: 6, kind: input, shape index: {}]   ;;  %s1949_s7 = inlined_call_operand.hbm [shape: f32[1,128], index: 7, kind: input, shape index: {}]   ;;  %s1950_s8 = inlined_call_operand.vmem [shape: bf16[128,128], index: 8, kind: input, shape index: {}]   ;;  %s1951_s9 = inlined_call_operand.vmem [shape: f32[1,128], index: 9, kind: input, shape index: {}]   ;;  %s1952_s10 = inlined_call_operand.vmem [shape: f32[2,8,8,128], index: 10, kind: output, shape index: {0}]   ;;  %s1953_s11 = inlined_call_operand.vmem [shape: f32[2,8,128], index: 11, kind: output, shape index: {1}]  }
   0x1   :  { %18 = vsyncpa [#allocation5], 0  ;;  %s1612_s17 = smov 0   ;;  %s1614_s18 = smov 0  }
   0x2   :  { %s1616_s19 = smov 0   ;;  %s1618_s20 = smov 0  }
   0x3   :  { %s1620_s21 = smov 0  }
   0x4 LB: > { %s1166_s22 = sadd.s32 4294967295, %s1544_s21   ;;  %s33_s23 = sadd.s32 1, %s1536_s19  ;;  %s1544_s21 = sphi %s1620_s21, %s24_s21   ;;  %s1540_s20 = sphi %s1618_s20, %s1969_s20   ;;  %s1536_s19 = sphi %s1616_s19, %s1968_s19   ;;  %s1532_s18 = sphi %s1614_s18, %s1967_s18   ;;  %s1528_s17 = sphi %s1612_s17, %s1966_s17  }
   0x5   : > { %p34_p0 = scmp.ge.s32.totalorder %s33_s23, 8  ;;  %s36_s24 = sadd.s32 1, %s1540_s20 }
   0x6   : > { %p1168_p1 = scmp.ge.s32.totalorder %s1544_s21, 1  ;;  %p317_p2 = scmp.lt.s32.totalorder %s1544_s21, 17 }
   0x7   : > { %s1971_s23 = smov (%p34_p0, %s33_s23), 0  ;;  %s1973_s24 = smov (!%p34_p0, %s36_s24), %s1540_s20 }
   0x8   : > { %1957 = sst [smem:[#allocation8_spill]] %s1971_s23  ;;  %p1645_p3 = pnand %p1168_p1, %p317_p2 }
   0x9   : > { %p38_p4 = scmp.ge.s32.totalorder %s1973_s24, 2  ;;  %p1649_p5 = scmp.eq.s32.totalorder %s1166_s22, 0 }
   0xa   : > { %s1958_s25 = scalar_select %p1645_p3, 1, 0 }
   0xb   : > { %s1959_s26 = scalar_select %p1649_p5, 1, 0 }
   0xc   : > { %p1327_p6 = pneg %p1645_p3  ;;  %s1975_s24 = smov (%p38_p4, %s1973_s24), 0 }
   0xd   : > { %1960 = sst [smem:[#allocation9_spill]] %s1975_s24  ;;  %s1546_s27 = smov [#allocation2]  }
   0xe   : > { %s333_s28 = sshll.u32 %s1546_s27, 4  ;;  %p1659_p7 = pnand %p1649_p5, %p1327_p6  ;;  %s334_s28 = int_to_ptr.vmem [resolvable:$true] %s333_s28 }
   0xf   : > { %s1547_s30 = smov [#allocation4]   ;;  %s1442_s15 = scalar_lea.hbm %s1945_s3, 16 }
  0x10   : > { %s353_s12 = sshll.u32 %s1547_s30, 4  ;;  %p1443_p8 = scmp.ne.s32.totalorder %s1945_s3, %s1442_s15  ;;  %s354_s12 = int_to_ptr.vmem [resolvable:$true] %s353_s12 }
  0x11   : > { %p1444_p9 = pneg %p1659_p7  ;;  %p1449_p12 = scmp.lt.u32.totalorder %s1442_s15, %s1945_s3 }
  0x13   : > { %p1445_p10 = pnand %p1444_p9, %p1443_p8 }
  0x15   : > { %p1446_p11 = pneg %p1445_p10 }
  0x17   : > { %p1451_p13 = pnand %p1449_p12, %p1446_p11 }
  0x19   : > { %1454 = shalt.err (!%p1451_p13)
}
  0x1a   : > { %s1455_s30 = scalar_lea.vmem %s334_s28, 16  ;;  %s1462_s13 = scalar_lea.vmem %s334_s28, 32 }
  0x1b   : > { %p1456_p0 = scmp.ne.s32.totalorder %s334_s28, %s1455_s30  ;;  %p1463_p4 = scmp.lt.s32.totalorder %s334_s28, %s334_s28 }
  0x1c   : > { %p1464_p6 = scmp.lt.s32.totalorder %s1462_s13, %s1455_s30 }
  0x1d   : > { %p1458_p1 = pnand %p1456_p0, %p1444_p9 }
  0x1e   : > { %p1465_p5 = por %p1464_p6, %p1463_p4 }
  0x1f   : > { %p1459_p2 = pneg %p1458_p1 }
  0x21   : > { %p1466_p3 = pnand %p1465_p5, %p1459_p2 }
  0x23   : > { %1469 = shalt.err (!%p1466_p3)
}
  0x24   : > { %1330 = dma.hbm_to_vmem [thread:$0]  (!%p1659_p7), %s1945_s3, 16, %s334_s28, [#allocation3]  }
  0x25   : > { %s1470_s22 = scalar_lea.hbm %s1949_s7, 16 }
  0x26   : > { %p1471_p8 = scmp.ne.s32.totalorder %s1949_s7, %s1470_s22  ;;  %p1477_p10 = scmp.lt.u32.totalorder %s1470_s22, %s1949_s7 }
  0x28   : > { %p1473_p5 = pnand %p1471_p8, %p1444_p9 }
  0x2a   : > { %p1474_p3 = pneg %p1473_p5 }
  0x2c   : > { %p1479_p11 = pnand %p1477_p10, %p1474_p3 }
  0x2e   : > { %1482 = shalt.err (!%p1479_p11)
}
  0x2f   : > { %s1483_s28 = scalar_lea.vmem %s354_s12, 16  ;;  %s1490_s14 = scalar_lea.vmem %s354_s12, 32 }
  0x30   : > { %p1484_p12 = scmp.ne.s32.totalorder %s354_s12, %s1483_s28  ;;  %p1491_p1 = scmp.lt.s32.totalorder %s354_s12, %s354_s12 }
  0x31   : > { %p1492_p2 = scmp.lt.s32.totalorder %s1490_s14, %s1483_s28 }
  0x32   : > { %p1486_p13 = pnand %p1484_p12, %p1444_p9 }
  0x33   : > { %p1493_p4 = por %p1492_p2, %p1491_p1 }
  0x34   : > { %p1487_p0 = pneg %p1486_p13 }
  0x36   : > { %p1494_p6 = pnand %p1493_p4, %p1487_p0 }
  0x38   : > { %1497 = shalt.err (!%p1494_p6)
}
  0x39   : > { %1333 = dma.hbm_to_vmem [thread:$0]  (!%p1659_p7), %s1949_s7, 16, %s354_s12, [#allocation5]  }
  0x3a   : > { %p1962_p8 = scmp.ne.s32.totalorder %s1958_s25, 0 }
  0x3b   : > { %p1963_p5 = scmp.ne.s32.totalorder (!%p1962_p8), %s1959_s26, 0 }
  0x3c   : > { %390 = sbr.rel (%p1962_p8) target bundleno = 1469 (0x5bd), region = 60 }
  0x43   : > { %1519 = dma.done.wait (%p1963_p5), [#allocation3], 16  }
  0x44   : > { %1521 = vsyncadd (%p1963_p5), [#allocation3], 4294967280 }
  0x45   : > { %1523 = dma.done.wait (%p1963_p5), [#allocation5], 16  }
  0x46   : > { %1525 = vsyncadd (%p1963_p5), [#allocation5], 4294967280  ;;  %p448_p7 = scmp.lt.s32.totalorder %s1532_s18, 1  ;;  %p450_p9 = scmp.lt.s32.totalorder %s1528_s17, 7  ;;  %v473_v0 = vlaneseq }
  0x47   : > { %p1181_p3 = scmp.ne.s32.totalorder %s1528_s17, 0 }
  0x48   : > { %s1977_s18 = smov (!%p448_p7, %s1532_s18), 1  ;;  %v1719_v1 = vand.u32 127, %v473_v0 }
  0x49   : > { %s451_s25 = scalar_select %p450_p9, %s1528_s17, 7 }
  0x4a   : > { %s1175_s29 = sshll.u32 %s1977_s18, 3  ;;  %vm475_vm0 = vcmp.lt.s32.totalorder %v1719_v1, 64  ;;  %479 = sbr.rel (%p1181_p3) target bundleno = 81 (0x51), region = 72 }
  0x4b   : > { %s453_s12 = sadd.s32 %s1175_s29, %s451_s25  ;;  %s459_s26 = scalar_lea.vmem %s1943_s1, %s1175_s29 }
  0x4c   : > { %s1726_s22 = sshll.u32 %s453_s12, 3  ;;  %s1731_s13 = scalar_lea.vmem %s1953_s11, %s1175_s29  ;;  %v480_v2 = vld [vmem:[%s459_s26] sm:$0xff] (!%p1181_p3) }
  0x4d   : > { %s455_s18 = scalar_lea.vmem %s1942_s0, %s1726_s22  ;;  %s467_s25 = scalar_lea.vmem %s1952_s10, %s1726_s22  ;;  %481 = vst [vmem:[%s1731_s13] sm:$0xff] (!%p1181_p3), %v480_v2 }
  0x51 PF: > { %v1384_v3 = vld [vmem:[%s1944_s2] sm:$0xff]   ;;  %v1548_v4 = vmov 0.0   ;;  %v1385_v5 = vld [vmem:[%s1944_s2 + $0x8] sm:$0xff]   ;;  %vm1549_vm1 = vmmov 0   ;;  %v1386_v6 = vld [vmem:[%s1944_s2 + $0x10] sm:$0xff]   ;;  %v1550_v32 = vmov 0  }
  0x52   : > { %1257 = vmatprep.subr.bf16.mxu0 %v1548_v4  ;;  %1273 = vmatprep.mubr.msk.bf16.mxu0 %vm1549_vm1, %v1548_v4  ;;  %v1387_v7 = vld [vmem:[%s1944_s2 + $0x18] sm:$0xff]   ;;  %v1392_v8 = vld [vmem:[%s1946_s4 + $0x4] ss:$8 sps:$4 sm:$0xff]   ;;  %v1394_v9 = vld [vmem:[%s1946_s4] ss:$8 sps:$4 sm:$0xff]   ;;  %v619_v42 = vshrl.u32 %v473_v0, 7 }
  0x53   : > { %1258 = vmatpush3.bf16.msra.mxu0 %v1384_v3  ;;  %v1395_v10 = vld [vmem:[%s1946_s4 + $0x14] ss:$8 sps:$4 sm:$0xff]   ;;  %708 = vmatprep.subr.bf16.mxu1 %v1392_v8  ;;  %v1397_v11 = vld [vmem:[%s1946_s4 + $0x10] ss:$8 sps:$4 sm:$0xff]   ;;  %v1398_v12 = vld [vmem:[%s1946_s4 + $0x24] ss:$8 sps:$4 sm:$0xff]  }
  0x54   : > { %1259 = vmatprep.subr.bf16.mxu0 %v1548_v4  ;;  %709 = vmatpush1.bf16.msra.mxu1 %v1394_v9  ;;  %v1388_v13 = vld [vmem:[%s1944_s2 + $0x20] sm:$0xff]   ;;  %v1389_v14 = vld [vmem:[%s1944_s2 + $0x28] sm:$0xff]   ;;  %v1401_v16 = vld [vmem:[%s1946_s4 + $0x34] ss:$8 sps:$4 sm:$0xff]   ;;  %v620_v43 = vsub.s32 0, %v619_v42  ;;  %s1551_s16 = smov 64  }
  0x55   : > { %710 = vmatprep.subr.bf16.mxu1 %v1395_v10  ;;  %v1400_v15 = vld [vmem:[%s1946_s4 + $0x20] ss:$8 sps:$4 sm:$0xff]   ;;  %v1403_v17 = vld [vmem:[%s1946_s4 + $0x30] ss:$8 sps:$4 sm:$0xff]   ;;  %v1404_v18 = vld [vmem:[%s1946_s4 + $0x44] ss:$8 sps:$4 sm:$0xff]   ;;  %740 = vmatprep.mubr.bf16.mxu1 %v1550_v32 }
  0x56   : > { %v1390_v19 = vld [vmem:[%s1944_s2 + $0x30] sm:$0xff]   ;;  %v1800_v20 = vld [vmem:[%s1731_s13] sm:$0xff]  ;;  %v1391_v24 = vld [vmem:[%s1944_s2 + $0x38] sm:$0xff]   ;;  %v624_v2 = vsub.s32 1, %v619_v42  ;;  %vm1000_vm2 = vcmp.eq.s32.totalorder %v1719_v1, 127 }
  0x57   : > { %1260 = vmatpush3.bf16.msra.mxu0 %v1385_v5  ;;  %v483_v21 = vld [vmem:[%s455_s18] sm:$0xff]  ;;  %v1407_v23 = vld [vmem:[%s1946_s4 + $0x54] ss:$8 sps:$4 sm:$0xff]   ;;  %v1409_v26 = vld [vmem:[%s1946_s4 + $0x50] ss:$8 sps:$4 sm:$0xff]  }
  0x58   : > { %1261 = vmatprep.subr.bf16.mxu0 %v1548_v4  ;;  %711 = vmatpush1.bf16.msra.mxu1 %v1397_v11  ;;  %v1406_v22 = vld [vmem:[%s1946_s4 + $0x40] ss:$8 sps:$4 sm:$0xff]   ;;  %v484_v25 = vsel %vm475_vm0, %v1800_v20, %v483_v21  ;;  %v1410_v28 = vld [vmem:[%s1946_s4 + $0x64] ss:$8 sps:$4 sm:$0xff]   ;;  %v1413_v30 = vld [vmem:[%s1946_s4 + $0x74] ss:$8 sps:$4 sm:$0xff]  }
  0x59   : > { %712 = vmatprep.subr.bf16.mxu1 %v1398_v12  ;;  %v485_v27 = vpack.c.bf16 %v484_v25, %v484_v25  ;;  %v1412_v29 = vld [vmem:[%s1946_s4 + $0x60] ss:$8 sps:$4 sm:$0xff]   ;;  %v1415_v31 = vld [vmem:[%s1946_s4 + $0x70] ss:$8 sps:$4 sm:$0xff]  }
  0x5a   : > { %v1182_v33 = vld [vmem:[#allocation2] ss:$0 sm:$0xff]  ;;  %v1417_v59 = vld [vmem:[%s1948_s6 + $0x8] sm:$0xff]   ;;  %v1418_v60 = vld [vmem:[%s1948_s6 + $0x10] sm:$0xff]  }
  0x5b   : > { %1262 = vmatpush3.bf16.msra.mxu0 %v1386_v6  ;;  %v616_v44 = vld [vmem:[%s1947_s5] sm:$0x3]  ;;  %v1419_v61 = vld [vmem:[%s1948_s6 + $0x18] sm:$0xff]   ;;  %v1421_v63 = vld [vmem:[%s1948_s6 + $0x28] sm:$0xff]  }
  0x5c   : > { %1263 = vmatprep.subr.bf16.mxu0 %v1548_v4  ;;  %713 = vmatpush1.bf16.msra.mxu1 %v1400_v15  ;;  %v621_v45 = vrot.slane %v616_v44, %v620_v43  ;;  %v1416_v58 = vld [vmem:[%s1948_s6] sm:$0xff]   ;;  %v1422_v0 = vld [vmem:[%s1948_s6 + $0x30] sm:$0xff]   ;;  %v625_v3 = vrot.slane %v616_v44, %v624_v2  ;;  %v1429_v21 = vld [vmem:[%s1950_s8 + $0x28] sm:$0xff]  }
  0x5d   : > { %714 = vmatprep.subr.bf16.mxu1 %v1401_v16  ;;  %v1420_v62 = vld [vmem:[%s1948_s6 + $0x20] sm:$0xff]   ;;  %v1425_v16 = vld [vmem:[%s1950_s8 + $0x8] sm:$0xff]  }
  0x5e   : > { %v1424_v15 = vld [vmem:[%s1950_s8] sm:$0xff]  }
  0x5f   : > { %1264 = vmatpush3.bf16.msra.mxu0 %v1387_v7 }
  0x60   : > { %1265 = vmatprep.subr.bf16.mxu0 %v1548_v4  ;;  %715 = vmatpush1.bf16.msra.mxu1 %v1403_v17  ;;  %v1426_v17 = vld [vmem:[%s1950_s8 + $0x10] sm:$0xff]  }
  0x61   : > { %716 = vmatprep.subr.bf16.mxu1 %v1404_v18 }
  0x63   : > { %1266 = vmatpush3.bf16.msra.mxu0 %v1388_v13 }
  0x64   : > { %1267 = vmatprep.subr.bf16.mxu0 %v1548_v4  ;;  %717 = vmatpush1.bf16.msra.mxu1 %v1406_v22 }
  0x65   : > { %718 = vmatprep.subr.bf16.mxu1 %v1407_v23 }
  0x67   : > { %1268 = vmatpush3.bf16.msra.mxu0 %v1389_v14  ;;  %v1423_v14 = vld [vmem:[%s1948_s6 + $0x38] sm:$0xff]  }
  0x68   : > { %1269 = vmatprep.subr.bf16.mxu0 %v1548_v4  ;;  %719 = vmatpush1.bf16.msra.mxu1 %v1409_v26  ;;  %v1430_v26 = vld [vmem:[%s1950_s8 + $0x30] sm:$0xff]  }
  0x69   : > { %720 = vmatprep.subr.bf16.mxu1 %v1410_v28  ;;  %v1210_v28 = vld [vmem:[#allocation4] ss:$0 sm:$0xff] }
  0x6b   : > { %1270 = vmatpush3.bf16.msra.mxu0 %v1390_v19  ;;  %v1427_v19 = vld [vmem:[%s1950_s8 + $0x18] sm:$0xff]  }
  0x6c   : > { %1271 = vmatprep.subr.bf16.mxu0 %v1548_v4  ;;  %721 = vmatpush1.bf16.msra.mxu1 %v1412_v29 }
  0x6d   : > { %722 = vmatprep.subr.bf16.mxu1 %v1413_v30 }
  0x6f   : > { %1272 = vmatpush3.bf16.msra.mxu0 %v1391_v24 }
  0x70   : > { %1277 = vmatprep.subr.bf16.mxu0 %v1548_v4  ;;  %723 = vmatpush1.bf16.msra.mxu1 %v1415_v31 }
  0x71   : > { %1297 = vmatprep.subr.bf16.mxu1 %v1548_v4 }
  0x72   : > { %1274 = vmatmul.mubr.bf16.vlgmr.msra.gmra.mrb[0].mxu0 %v485_v27  ;;  %v1431_v27 = vld [vmem:[%s1950_s8 + $0x38] sm:$0xff]  }
  0x73   : > { %1293 = vmatprep.mubr.msk.bf16.mxu0 %vm1549_vm1, %v1548_v4  ;;  %1278 = vmatpush3.bf16.msra.mxu0 %v1416_v58 }
  0x74   : > { %1279 = vmatprep.subr.bf16.mxu0 %v1548_v4 }
  0x77   : > { %1280 = vmatpush3.bf16.msra.mxu0 %v1417_v59 }
  0x78   : > { %1281 = vmatprep.subr.bf16.mxu0 %v1548_v4 }
  0x7b   : > { %1282 = vmatpush3.bf16.msra.mxu0 %v1418_v60 }
  0x7c   : > { %1283 = vmatprep.subr.bf16.mxu0 %v1548_v4 }
  0x7f   : > { %1284 = vmatpush3.bf16.msra.mxu0 %v1419_v61 }
  0x80   : > { %1285 = vmatprep.subr.bf16.mxu0 %v1548_v4 }
  0x83   : > { %1286 = vmatpush3.bf16.msra.mxu0 %v1420_v62 }
  0x84   : > { %1287 = vmatprep.subr.bf16.mxu0 %v1548_v4 }
  0x87   : > { %1288 = vmatpush3.bf16.msra.mxu0 %v1421_v63 }
  0x88   : > { %1289 = vmatprep.subr.bf16.mxu0 %v1548_v4 }
  0x8b   : > { %1290 = vmatpush3.bf16.msra.mxu0 %v1422_v0 }
  0x8c   : > { %1291 = vmatprep.subr.bf16.mxu0 %v1548_v4 }
  0x8f   : > { %1292 = vmatpush3.bf16.msra.mxu0 %v1423_v14 }
 0x145   : > { %v591_v34 = vpop.f32.mrb[0].mxu0 }
 0x146   : > { %v592_v35 = vadd.f32 %v1182_v33, %v591_v34  ;;  %v1275_v36 = vpop.f32.mrb[1].mxu0 }
 0x147   : > { %v594_v37 = vpop.f32.mrb[2].mxu0  ;;  %v1219_v36 = vld [vmem:[%s1951_s9] ss:$0 sm:$0xff] }
 0x148   : > { %v597_v38 = vmax.f32 %v592_v35, 0.0  ;;  %v1276_v39 = vpop.f32.mrb[3].mxu0 }
 0x14a   : > { %v598_v40 = vsel %vm475_vm0, %v597_v38, %v592_v35 }
 0x14b   : > { %v599_v41 = vpack.c.bf16 %v598_v40, %v598_v40 }
 0x14d   : > { %741 = vmatmul.mubr.bf16.vlgmr.msra.gmra.mrb[0].mxu1 %v599_v41 }
 0x14e   : > { %1313 = vmatprep.mubr.msk.bf16.mxu1 %vm1549_vm1, %v1548_v4  ;;  %1298 = vmatpush3.bf16.msra.mxu1 %v1424_v15 }
 0x14f   : > { %1299 = vmatprep.subr.bf16.mxu1 %v1548_v4 }
 0x152   : > { %1300 = vmatpush3.bf16.msra.mxu1 %v1425_v16 }
 0x153   : > { %1301 = vmatprep.subr.bf16.mxu1 %v1548_v4 }
 0x156   : > { %1302 = vmatpush3.bf16.msra.mxu1 %v1426_v17 }
 0x157   : > { %1303 = vmatprep.subr.bf16.mxu1 %v1548_v4 }
 0x15a   : > { %1304 = vmatpush3.bf16.msra.mxu1 %v1427_v19 }
 0x15b   : > { %1305 = vmatprep.subr.bf16.mxu1 %v1548_v4 }
 0x220   : > { %v742_v46 = vpop.f32.mrb[0].mxu1 }
 0x221   : > { %v743_v47 = vadd.f32 %v742_v46, %v621_v45  ;;  %v744_v48 = vpop.f32.mrb[1].mxu1 }
 0x222   : > { %v746_v49 = vpop.f32.mrb[2].mxu1  ;;  %v745_v5 = vadd.f32 %v744_v48, %v625_v3 }
 0x223   : > { %v1207_v50 = vmul.f32 -1.442695, %v743_v47  ;;  %v747_v51 = vpop.f32.mrb[3].mxu1 }
 0x224   : > { %v1209_v6 = vmul.f32 -1.442695, %v745_v5 }
 0x225   : > { %1432 = vpow2.f32 %v1207_v50 }
 0x22f   : > { %v1433_v52 = vpop.eup %1432 }
 0x230   : > { %v752_v53 = vadd.f32 1.0, %v1433_v52 }
 0x232   : > { %1434 = vrcp.f32 %v752_v53 }
 0x233   : > { %1436 = vpow2.f32 %v1209_v6 }
 0x23c   : > { %v1435_v54 = vpop.eup %1434 }
 0x23d   : > { %v755_v55 = vmul.f32 2.0, %v1435_v54  ;;  %v1437_v7 = vpop.eup %1436 }
 0x23e   : > { %v761_v8 = vadd.f32 1.0, %v1437_v7 }
 0x23f   : > { %v1208_v56 = vadd.f32 -1.0, %v755_v55 }
 0x240   : > { %1438 = vrcp.f32 %v761_v8 }
 0x241   : > { %v757_v57 = vsel %vm475_vm0, %v1435_v54, %v1208_v56 }
 0x242   : > { %764 = vrot.lane.b32.xlu0 %v757_v57, %s1551_s16 }
 0x24a   : > { %v1439_v9 = vpop.eup %1438 }
 0x24b   : > { %v767_v11 = vmul.f32 %v1439_v9, %v1800_v20  ;;  %v1428_v20 = vld [vmem:[%s1950_s8 + $0x20] sm:$0xff]  }
 0x24c   : > { %1306 = vmatpush3.bf16.msra.mxu1 %v1428_v20 }
 0x24d   : > { %1307 = vmatprep.subr.bf16.mxu1 %v1548_v4 }
 0x250   : > { %1308 = vmatpush3.bf16.msra.mxu1 %v1429_v21 }
 0x251   : > { %1309 = vmatprep.subr.bf16.mxu1 %v1548_v4 }
 0x254   : > { %1310 = vmatpush3.bf16.msra.mxu1 %v1430_v26 }
 0x255   : > { %1311 = vmatprep.subr.bf16.mxu1 %v1548_v4 }
 0x258   : > { %1312 = vmatpush3.bf16.msra.mxu1 %v1431_v27 }
 0x2b4   : > { %v765_v10 = vpop.permute.xlu0 %764 }
 0x2b5   : > { %v766_v12 = vmul.f32 %v765_v10, %v757_v57 }
 0x2b7   : > { %v768_v13 = vadd.f32 %v767_v11, %v766_v12 }
 0x2b9   : > { %1440 = vtanh.f32 %v768_v13 }
 0x2c3   : > { %v1441_v18 = vpop.eup %1440 }
 0x2c4   : > { %770 = vrot.lane.b32.xlu0 %v1441_v18, %s1551_s16 }
 0x336   : > { %v771_v22 = vpop.permute.xlu0 %770 }
 0x337   : > { %v772_v23 = vmul.f32 %v1439_v9, %v771_v22 }
 0x339   : > { %v773_v24 = vsel %vm475_vm0, %v772_v23, %v768_v13 }
 0x33a   : > { %774 = vst [vmem:[%s1731_s13] sm:$0xff] %v773_v24  ;;  %v775_v25 = vpack.c.bf16 %v773_v24, %v773_v24 }
 0x33c   : > { %1294 = vmatmul.mubr.bf16.vlgmr.msra.gmra.mrb[4].mxu0 %v775_v25 }
 0x40f   : > { %v881_v29 = vpop.f32.mrb[4].mxu0 }
 0x410   : > { %v882_v30 = vadd.f32 %v1210_v28, %v881_v29  ;;  %v1295_v31 = vpop.f32.mrb[5].mxu0 }
 0x411   : > { %v884_v32 = vpop.f32.mrb[6].mxu0 }
 0x412   : > { %v887_v33 = vmax.f32 %v882_v30, 0.0  ;;  %v1296_v34 = vpop.f32.mrb[7].mxu0 }
 0x414   : > { %v888_v35 = vpack.c.bf16 %v887_v33, %v887_v33 }
 0x416   : > { %1314 = vmatmul.mubr.bf16.vlgmr.msra.gmra.mrb[4].mxu1 %v888_v35 }
 0x4e9   : > { %v994_v37 = vpop.f32.mrb[4].mxu1 }
 0x4ea   : > { %v995_v4 = vadd.f32 %v1219_v36, %v994_v37  ;;  %v1315_v38 = vpop.f32.mrb[5].mxu1 }
 0x4eb   : > { %v997_v39 = vpop.f32.mrb[6].mxu1 }
 0x4ec   : > { %v1316_v40 = vpop.f32.mrb[7].mxu1  ;;  %v1001_v41 = vsel %vm1000_vm2, %v995_v4, 0.0 }
 0x4ed   : > { %1002 = vadd.xlane.f32.xlu1 %v1001_v41 }
 0x57a   : > { %v1003_v42 = vpop.xlane.xlu1 %1002 }
 0x57b   : > { %v1004_v43 = vrot.slane %v1003_v42, 4 }
 0x57d   : > { %v1005_v44 = vadd.f32 %v1004_v43, %v1003_v42 }
 0x57f   : > { %v1006_v45 = vrot.slane %v1005_v44, 2 }
 0x581   : > { %v1007_v46 = vadd.f32 %v1006_v45, %v1005_v44 }
 0x583   : > { %v1008_v47 = vrot.slane %v1007_v46, 1 }
 0x585   : > { %v1009_v48 = vadd.f32 %v1008_v47, %v1007_v46 }
 0x587   : > { %1317 = vpush %v1009_v48 }
 0x5b8   : > { %s1318_s24 = spop %1317 }
 0x5b9   : > { %v1011_v49 = vstv %s1318_s24 }
 0x5ba   : > { %v1012_v50 = vsub.f32 %v995_v4, %v1011_v49 }
 0x5bc   : > { %1013 = vst [vmem:[%s467_s25] sm:$0xff] %v1012_v50 }
 0x5bd PF: > { %s24_s21 = sadd.s32 1, %s1544_s21   ;;  %s1964_s29 = sld [smem:[#allocation8_spill]] }
 0x5be   : > { %p21_p10 = scmp.ge.s32.totalorder %s24_s21, 18   ;;  %s1965_s26 = sld [smem:[#allocation9_spill]] }
 0x5bf   : > { %s1966_s17 = smov %s1536_s19  ;;  %s1967_s18 = smov %s1540_s20 }
 0x5c0   :  { %23 = sbr.rel (!%p21_p10) target bundleno = 4 (0x4), region = 118 }
 0x5c3   : > { %s1968_s19 = smov %s1964_s29 }
 0x5c4   : > { %s1969_s20 = smov %s1965_s26 }
 0x5c7   :  { %1055 = vsyncpa [#allocation3], 1 }
 0x5c8   :  { %1057 = vsyncpa [#allocation3 + $0x1], 1 }
 0x5c9   :  { %1058 = vsyncpa [#allocation5], 1 }

</bundles_post_ra>
